<compile_context>
chip_gen: v6e
topology: v6e:2x2x1
jax: 0.10.0
libtpu: 0.0.40
codegen_flags: <defaults>
</compile_context>

<pallas_src>
import functools
import math

import jax
import jax.numpy as jnp
from jax import lax
from jax.experimental import pallas as pl
from jax.experimental.pallas import tpu as pltpu


_LANE = 128   # last-dim (lane) granularity


def _round_up(x: int, m: int) -> int:
    return ((x + m - 1) // m) * m


def _min_sublane(*dtypes) -> int:
    """Minimum legal second-to-last tile dim for the given dtypes."""
    s = 8
    for d in dtypes:
        if d is not None:
            s = max(s, 32 // jnp.dtype(d).itemsize)   # f32: 8, bf16: 16, int8: 32
    return s


def _cast(x, dtype):
    return x if dtype is None else x.astype(dtype)


def _apply_activation(y, activation):
    """Activation epilogue on the f32 accumulator (called inside kernels only)."""
    if activation == "relu":
        return jnp.maximum(y, 0.0)                              # VPU
    if activation == "tanh":
        return jnp.tanh(y)                                      # EUP
    if activation == "sigmoid":
        # approx reciprocal lands on the otherwise-idle EUP slot in the epilogue
        return pl.reciprocal(1.0 + jnp.exp(-y), approx=True)
    if activation == "none":
        return y
    raise ValueError(f"Invalid activation function: {activation}")


# --------------------------------------------------------------------------
# Kernels.  All take a pre-transposed weight tile wt_ref: [tk, tn].
# --------------------------------------------------------------------------
def _linear_single_k_kernel(x_ref, wt_ref, b_ref, o_ref, *, activation, compute_dtype):
    """Whole K in one grid step: no accumulator, no init/finalize."""
    y = jnp.dot(_cast(x_ref[...], compute_dtype),
                _cast(wt_ref[...], compute_dtype),
                preferred_element_type=jnp.float32)
    y = y + b_ref[...].astype(jnp.float32)
    o_ref[...] = _apply_activation(y, activation).astype(o_ref.dtype)


def _linear_multi_k_out_acc_kernel(x_ref, wt_ref, b_ref, o_ref, *, activation,
                                   compute_dtype):
    """K-tiled, f32 output: accumulate directly into the resident o_ref block."""
    k = pl.program_id(2)

    @pl.when(k == 0)
    def _init():
        o_ref[...] = jnp.zeros_like(o_ref)

    o_ref[...] += jnp.dot(_cast(x_ref[...], compute_dtype),
                          _cast(wt_ref[...], compute_dtype),
                          preferred_element_type=jnp.float32)

    @pl.when(k == pl.num_programs(2) - 1)
    def _finalize():
        y = o_ref[...] + b_ref[...].astype(jnp.float32)
        o_ref[...] = _apply_activation(y, activation).astype(o_ref.dtype)


def _linear_multi_k_scratch_acc_kernel(x_ref, wt_ref, b_ref, o_ref, acc_ref, *,
                                       activation, compute_dtype):
    """K-tiled, non-f32 output: f32 VMEM accumulator, cast once at finalize."""
    k = pl.program_id(2)

    @pl.when(k == 0)
    def _init():
        acc_ref[...] = jnp.zeros_like(acc_ref)

    acc_ref[...] += jnp.dot(_cast(x_ref[...], compute_dtype),
                            _cast(wt_ref[...], compute_dtype),
                            preferred_element_type=jnp.float32)

    @pl.when(k == pl.num_programs(2) - 1)
    def _finalize():
        y = acc_ref[...] + b_ref[...].astype(jnp.float32)
        o_ref[...] = _apply_activation(y, activation).astype(o_ref.dtype)


# --------------------------------------------------------------------------
# Tiling / padding helpers.
# --------------------------------------------------------------------------
def _pad2d(a, rows, cols):
    r, c = a.shape
    if r == rows and c == cols:      # skip the HBM copy when already aligned
        return a
    return jnp.pad(a, ((0, rows - r), (0, cols - c)))


def _pick_feature_tiles(in_f, out_f, tn_max=512, tk_max=1024, k_single_max=2048):
    """Padded (Kp, Np) and tile sizes (tk, tn); collapses K when it fits."""
    Np = _round_up(out_f, _LANE)
    if Np <= tn_max:
        tn = Np
    else:
        tn = tn_max
        Np = _round_up(out_f, tn)
    Kp = _round_up(in_f, _LANE)
    if Kp <= k_single_max:
        tk = Kp                       # single K grid step
    else:
        tk = tk_max
        Kp = _round_up(in_f, tk)
    return Kp, Np, tk, tn


def _pick_batch_tile(B, sublane, tm_max=512):
    Bp = _round_up(B, sublane)
    if Bp <= tm_max:
        return Bp, Bp
    tm = tm_max                       # 512 is a multiple of both 8 and 16
    return _round_up(B, tm), tm


def _vmem_limit_bytes(tm, tn, tk, x_item, w_item, out_item, use_acc):
    need = (2 * tm * tk * x_item          # x tile, double-buffered
            + 2 * tk * tn * w_item        # W^T tile, double-buffered
            + 2 * tm * tn * out_item      # output tile, double-buffered
            + 2 * tn * 4)                 # bias
    if use_acc:
        need += tm * tn * 4
    need = int(need * 2 + (2 << 20))      # headroom
    # budgeted for v7x's 64 MiB physical VMEM; also fine on v5e/v6e
    return max(32 << 20, min(need, 64 << 20))


def _prepare_weight_bias(weight, bias, Kp, Np, compute_dtype):
    """One-time pre-transpose + lane-dense pad (+ optional bf16 weight copy)."""
    wt = _pad2d(weight.T, Kp, Np)                       # [Kp, Np]
    if compute_dtype is not None:
        wt = wt.astype(compute_dtype)                   # halves weight DMA bytes
    b = _pad2d(bias.reshape(1, -1).astype(jnp.float32), 1, Np)
    return wt, b


def _linear_padded_call(x_p, wt_p, b_p, *, out_dtype, activation, compute_dtype,
                        tm, tn, tk):
    Bp, Kp = x_p.shape
    Kp2, Np = wt_p.shape
    assert Kp == Kp2 and Kp % tk == 0 and Np % tn == 0 and Bp % tm == 0
    nk = Kp // tk

    # v7x has 2 TensorCores sharded over "parallel" axes: make sure at least
    # one parallel axis has extent >= 2 when the feature dim allows it.
    if Bp // tm == 1 and Np // tn == 1 and tn % (2 * _LANE) == 0:
        tn //= 2
    grid_m, grid_n = Bp // tm, Np // tn

    out_is_f32 = jnp.dtype(out_dtype) == jnp.dtype(jnp.float32)

    if nk == 1:
        grid = (grid_m, grid_n)
        kernel = functools.partial(_linear_single_k_kernel,
                                   activation=activation, compute_dtype=compute_dtype)
        in_specs = [
            pl.BlockSpec((tm, tk), lambda i, j: (i, 0)),
            pl.BlockSpec((tk, tn), lambda i, j: (0, j)),
            pl.BlockSpec((1, tn), lambda i, j: (0, j)),
        ]
        out_specs = pl.BlockSpec((tm, tn), lambda i, j: (i, j))
        scratch_shapes = []
        dims = ("parallel", "parallel")
        use_acc = False
    else:
        grid = (grid_m, grid_n, nk)
        in_specs = [
            pl.BlockSpec((tm, tk), lambda i, j, k: (i, k)),
            pl.BlockSpec((tk, tn), lambda i, j, k: (k, j)),
            pl.BlockSpec((1, tn), lambda i, j, k: (0, j)),   # bias resident over K
        ]
        out_specs = pl.BlockSpec((tm, tn), lambda i, j, k: (i, j))
        dims = ("parallel", "parallel", "arbitrary")
        if out_is_f32:
            kernel = functools.partial(_linear_multi_k_out_acc_kernel,
                                       activation=activation,
                                       compute_dtype=compute_dtype)
            scratch_shapes = []
            use_acc = False
        else:
            kernel = functools.partial(_linear_multi_k_scratch_acc_kernel,
                                       activation=activation,
                                       compute_dtype=compute_dtype)
            scratch_shapes = [pltpu.VMEM((tm, tn), jnp.float32)]
            use_acc = True

    vmem = _vmem_limit_bytes(tm, tn, tk,
                             jnp.dtype(x_p.dtype).itemsize,
                             jnp.dtype(wt_p.dtype).itemsize,
                             jnp.dtype(out_dtype).itemsize, use_acc)

    return pl.pallas_call(
        kernel,
        out_shape=jax.ShapeDtypeStruct((Bp, Np), out_dtype),
        grid=grid,
        in_specs=in_specs,
        out_specs=out_specs,
        scratch_shapes=scratch_shapes,
        compiler_params=pltpu.CompilerParams(
            dimension_semantics=dims, vmem_limit_bytes=vmem),
    )(x_p, wt_p, b_p)


# --------------------------------------------------------------------------
# Public API: functional linear + nn.Linear-like module.
# --------------------------------------------------------------------------
def pallas_linear(x, weight, bias, activation="none", *, compute_dtype=None,
                  tm_max=512, tn_max=512, tk_max=1024, k_single_max=2048):
    """PyTorch nn.Linear semantics: y = activation(x @ weight^T + bias).

    x: (*, in_f), weight: [out_f, in_f], bias: [out_f] -> (*, out_f).
    Note: this functional path transposes/pads the weight per call; use
    LinearPallas for repeated calls with a fixed weight (pre-padded at init).
    """
    out_f, in_f = weight.shape
    assert x.shape[-1] == in_f and bias.shape == (out_f,)
    lead = x.shape[:-1]
    x2 = x.reshape(-1, in_f)
    B = x2.shape[0]

    sub = _min_sublane(x.dtype, compute_dtype)
    Kp, Np, tk, tn = _pick_feature_tiles(in_f, out_f, tn_max, tk_max, k_single_max)
    Bp, tm = _pick_batch_tile(B, sub, tm_max)

    x_p = _pad2d(x2, Bp, Kp)
    wt_p, b_p = _prepare_weight_bias(weight, bias, Kp, Np, compute_dtype)

    out = _linear_padded_call(x_p, wt_p, b_p, out_dtype=x.dtype,
                              activation=activation, compute_dtype=compute_dtype,
                              tm=tm, tn=tn, tk=tk)
    return out[:B, :out_f].reshape(*lead, out_f)


class LinearPallas:
    """Pallas TPU port of torch.nn.Linear (forward pass only).

    Weight is stored PyTorch-style ([out_f, in_f]); a pre-transposed,
    lane-dense padded copy is built ONCE at init so forward calls never
    re-copy the weight through HBM.
    """

    def __init__(self, in_features, out_features, *, key=None,
                 dtype=jnp.float32, compute_dtype=None, activation="none"):
        self.in_features = in_features
        self.out_features = out_features
        self.activation = activation
        self.compute_dtype = compute_dtype
        if key is None:
            key = jax.random.PRNGKey(0)
        kw, kb = jax.random.split(key)
        # torch.nn.Linear default init: U(-1/sqrt(in_f), 1/sqrt(in_f))
        bound = 1.0 / math.sqrt(in_features)
        weight = jax.random.uniform(kw, (out_features, in_features), dtype,
                                    -bound, bound)
        bias = jax.random.uniform(kb, (out_features,), dtype, -bound, bound)
        self.set_params(weight, bias)

    def set_params(self, weight, bias):
        assert weight.shape == (self.out_features, self.in_features)
        assert bias.shape == (self.out_features,)
        self.weight, self.bias = weight, bias
        self._Kp, self._Np, self._tk, self._tn = _pick_feature_tiles(
            self.in_features, self.out_features)
        self._wt_p, self._b_p = _prepare_weight_bias(
            weight, bias, self._Kp, self._Np, self.compute_dtype)

    def __call__(self, x):
        assert x.shape[-1] == self.in_features
        lead = x.shape[:-1]
        x2 = x.reshape(-1, self.in_features)
        B = x2.shape[0]
        sub = _min_sublane(x.dtype, self.compute_dtype)
        Bp, tm = _pick_batch_tile(B, sub)
        x_p = _pad2d(x2, Bp, self._Kp)
        out = _linear_padded_call(
            x_p, self._wt_p, self._b_p, out_dtype=x.dtype,
            activation=self.activation, compute_dtype=self.compute_dtype,
            tm=tm, tn=self._tn, tk=self._tk)
        return out[:B, :self.out_features].reshape(*lead, self.out_features)


if __name__ == "__main__":
    key = jax.random.PRNGKey(0)
    k1, k2, k3, k4, k5, k6 = jax.random.split(key, 6)

    # ---- 1) nn.Linear spec, 2-D input, single-K-step fast path -----------
    x = jax.random.normal(k1, (16, 1000), jnp.float32)
    w = jax.random.normal(k2, (40, 1000), jnp.float32) * 0.05
    b = jax.random.normal(k3, (40,), jnp.float32) * 0.1

    y = jax.block_until_ready(pallas_linear(x, w, b))
    y_ref = jnp.dot(x, w.T, precision=lax.Precision.HIGHEST) + b
    assert y.shape == (16, 40)
    assert jnp.allclose(y, y_ref, atol=2e-3, rtol=2e-3), (
        f"linear mismatch: {float(jnp.max(jnp.abs(y - y_ref)))}")

    y_t = jax.block_until_ready(pallas_linear(x, w, b, activation="tanh"))
    assert jnp.allclose(y_t, jnp.tanh(y_ref), atol=2e-3, rtol=2e-3)
    y_s = jax.block_until_ready(pallas_linear(x, w, b, activation="sigmoid"))
    assert jnp.allclose(y_s, jax.nn.sigmoid(y_ref), atol=2e-2, rtol=2e-2)

    # ---- 2) (*, H_in) leading dims via the module (pre-padded weights) ---
    lin = LinearPallas(20, 30, key=k4)
    x3 = jax.random.normal(k5, (4, 8, 20), jnp.float32)
    y3 = jax.block_until_ready(lin(x3))
    y3_ref = jnp.einsum("abi,oi->abo", x3, lin.weight,
                        precision=lax.Precision.HIGHEST) + lin.bias
    assert y3.shape == (4, 8, 30)
    assert jnp.allclose(y3, y3_ref, atol=2e-3, rtol=2e-3)

    # ---- 3) K-tiled path (padded K > single-step budget), relu epilogue --
    xb = jax.random.normal(k6, (64, 2560), jnp.float32)
    wb = jax.random.normal(k2, (256, 2560), jnp.float32) * 0.05
    bb = jax.random.normal(k3, (256,), jnp.float32) * 0.1
    yb = jax.block_until_ready(pallas_linear(xb, wb, bb, activation="relu"))
    yb_ref = jnp.maximum(jnp.dot(xb, wb.T, precision=lax.Precision.HIGHEST) + bb, 0.0)
    assert yb.shape == (64, 256)
    assert jnp.allclose(yb, yb_ref, atol=1e-2, rtol=1e-2), (
        f"tiled linear mismatch: {float(jnp.max(jnp.abs(yb - yb_ref)))}")

    # ---- 4) bf16 MXU operands with f32 accumulation ----------------------
    y16 = jax.block_until_ready(pallas_linear(x, w, b, compute_dtype=jnp.bfloat16))
    assert jnp.allclose(y16, y_ref, atol=6e-2, rtol=6e-2)

    print("KERNEL_OK")
</pallas_src>

<mosaic_0001>
module attributes {stable_mosaic.version = 11 : i64} {
  func.func @_linear_single_k_kernel(%arg0: i32, %arg1: i32, %arg2: memref<16x1024xf32, #tpu.memory_space<vmem>>, %arg3: memref<1024x128xf32, #tpu.memory_space<vmem>>, %arg4: memref<1x128xf32, #tpu.memory_space<vmem>>, %arg5: memref<16x128xf32, #tpu.memory_space<vmem>>) attributes {dimension_semantics = [#tpu.dimension_semantics<parallel>, #tpu.dimension_semantics<parallel>], iteration_bounds = array<i64: 1, 1>, scalar_prefetch = 0 : i64, scratch_operands = 0 : i64, tpu.core_type = #tpu.core_type<tc>, window_params = [{transform_indices = @transform_0, window_bounds = array<i64: 16, 1024>}, {transform_indices = @transform_1, window_bounds = array<i64: 1024, 128>}, {transform_indices = @transform_2, window_bounds = array<i64: 1, 128>}, {transform_indices = @transform_3, window_bounds = array<i64: 16, 128>}]} {
    %c0 = arith.constant 0 : index
    %c0_0 = arith.constant 0 : index
    %0 = vector.load %arg2[%c0, %c0_0] : memref<16x1024xf32, #tpu.memory_space<vmem>>, vector<16x1024xf32>
    %c0_1 = arith.constant 0 : index
    %c0_2 = arith.constant 0 : index
    %1 = vector.load %arg3[%c0_1, %c0_2] : memref<1024x128xf32, #tpu.memory_space<vmem>>, vector<1024x128xf32>
    %cst = arith.constant dense<0.000000e+00> : vector<16x128xf32>
    %2 = tpu.matmul %0, %1, %cst {dimension_numbers = #tpu.dot_dimension_numbers<[1], [0], [0], [1], [0, 0, 1, 1], [], []>} : vector<16x1024xf32>, vector<1024x128xf32>, vector<16x128xf32> -> vector<16x128xf32>
    %c0_3 = arith.constant 0 : index
    %c0_4 = arith.constant 0 : index
    %3 = vector.load %arg4[%c0_3, %c0_4] : memref<1x128xf32, #tpu.memory_space<vmem>>, vector<1x128xf32>
    %4 = vector.broadcast %3 : vector<1x128xf32> to vector<16x128xf32>
    %5 = arith.addf %2, %4 : vector<16x128xf32>
    %c0_5 = arith.constant 0 : index
    %c0_6 = arith.constant 0 : index
    %6 = vector.load %arg5[%c0_5, %c0_6] : memref<16x128xf32, #tpu.memory_space<vmem>>, vector<16x128xf32>
    tpu.vector_store %arg5[%c0_5, %c0_6], %5 {strides = array<i32>} : memref<16x128xf32, #tpu.memory_space<vmem>>, vector<16x128xf32>,
    return
  }
  func.func @transform_0(%arg0: i32, %arg1: i32) -> (i32, i32) {
    %c0_i32 = arith.constant 0 : i32
    %c0_i32_0 = arith.constant 0 : i32
    return %arg0, %c0_i32 : i32, i32
  }
  func.func @transform_1(%arg0: i32, %arg1: i32) -> (i32, i32) {
    %c0_i32 = arith.constant 0 : i32
    %c0_i32_0 = arith.constant 0 : i32
    return %c0_i32, %arg1 : i32, i32
  }
  func.func @transform_2(%arg0: i32, %arg1: i32) -> (i32, i32) {
    %c0_i32 = arith.constant 0 : i32
    %c0_i32_0 = arith.constant 0 : i32
    return %c0_i32, %arg1 : i32, i32
  }
  func.func @transform_3(%arg0: i32, %arg1: i32) -> (i32, i32) {
    %c0_i32 = arith.constant 0 : i32
    return %arg0, %arg1 : i32, i32
  }
}

</mosaic_0001>

<bundles_post_ra>
// kernel: tpu_custom_call.1
= control target key start
LH: loop header
LB: loop body
LE: loop exit
PB: predicated region body
PF: predicated region fallthrough
CT: control target
= control target key end

     0   :  { %8 = vsyncpa [#allocation3], 0  ;;  %s785_s0 = inlined_call_operand.hbm [shape: f32[16,1024], index: 0, kind: input, shape index: {}]   ;;  %s786_s1 = inlined_call_operand.hbm [shape: f32[1024,128], index: 1, kind: input, shape index: {}]   ;;  %s787_s2 = inlined_call_operand.vmem [shape: f32[1,128], index: 2, kind: input, shape index: {}]   ;;  %s788_s3 = inlined_call_operand.hbm [shape: f32[16,128], index: 3, kind: output, shape index: {}]  }
   0x1   :  { %9 = vsyncpa [#allocation6], 0 }
   0x2   :  { %10 = vsyncpa [#allocation4], 0  ;;  %s740_s12 = smov [#allocation2]  }
   0x3   :  { %s16_s13 = sshll.u32 %s740_s12, 4  ;;  %s17_s13 = int_to_ptr.vmem [resolvable:$true] %s16_s13 }
   0x4   :  { %s682_s14 = scalar_lea.vmem %s17_s13, 2048  ;;  %p687_p1 = scmp.lt.s32.totalorder %s17_s13, %s17_s13 }
   0x5   :  { %p683_p0 = scmp.ne.s32.totalorder %s17_s13, %s682_s14  ;;  %p688_p2 = scmp.lt.s32.totalorder %s682_s14, %s682_s14 }
   0x7   :  { %p689_p3 = por %p688_p2, %p687_p1 }
   0x9   :  { %p690_p4 = pnand %p689_p3, %p683_p0 }
   0xb   :  { %693 = shalt.err (!%p690_p4)
}
   0xc   :  { %s741_s15 = smov 1024   ;;  %s742_s16 = smov 64  }
   0xd   :  { %22 = dma.hbm_to_vmem [thread:$0]  %s785_s0, 2048, %s17_s13, [#allocation3], %s741_s15, %s741_s15, %s742_s16  }
   0xe   :  { %s743_s19 = smov [#allocation5]  }
   0xf   :  { %s28_s20 = sshll.u32 %s743_s19, 4  ;;  %s29_s20 = int_to_ptr.vmem [resolvable:$true] %s28_s20 }
  0x10   :  { %s702_s21 = scalar_lea.vmem %s29_s20, 16384  ;;  %p707_p6 = scmp.lt.s32.totalorder %s29_s20, %s29_s20 }
  0x11   :  { %p703_p5 = scmp.ne.s32.totalorder %s29_s20, %s702_s21  ;;  %p708_p7 = scmp.lt.s32.totalorder %s702_s21, %s702_s21 }
  0x13   :  { %p709_p8 = por %p708_p7, %p707_p6 }
  0x15   :  { %p710_p9 = pnand %p709_p8, %p703_p5 }
  0x17   :  { %713 = shalt.err (!%p710_p9)
}
  0x18   :  { %s744_s22 = smov 128   ;;  %s745_s23 = smov 8  }
  0x19   :  { %34 = dma.hbm_to_vmem [thread:$0]  %s786_s1, 16384, %s29_s20, [#allocation6], %s744_s22, %s744_s22, %s745_s23  }
  0x1a   :  { %734 = dma.done.wait [#allocation3], 2048  }
  0x1b   :  { %735 = vsyncadd [#allocation3], 4294965248 }
  0x1c   :  { %736 = dma.done.wait [#allocation6], 16384  }
  0x1d   :  { %737 = vsyncadd [#allocation6], 4294950912  ;;  %v90_v0 = vld [vmem:[#allocation5 + $0xf8] sm:$0xff]  ;;  %v89_v4 = vld [vmem:[#allocation5 + $0xf0] sm:$0xff] }
  0x1e   :  { %v122_v1 = vld [vmem:[#allocation5 + $0x1f8] sm:$0xff]  ;;  %515 = vmatprep.subr.mxu0 %v90_v0  ;;  %v121_v5 = vld [vmem:[#allocation5 + $0x1f0] sm:$0xff]  ;;  %v88_v8 = vld [vmem:[#allocation5 + $0xe8] sm:$0xff] }
  0x1f   :  { %v74_v2 = vld [vmem:[#allocation5 + $0x78] sm:$0xff]  ;;  %553 = vmatprep.subr.mxu1 %v122_v1  ;;  %v73_v6 = vld [vmem:[#allocation5 + $0x70] sm:$0xff]  ;;  %v120_v9 = vld [vmem:[#allocation5 + $0x1e8] sm:$0xff] }
  0x20   :  { %v106_v3 = vld [vmem:[#allocation5 + $0x178] sm:$0xff]  ;;  %516 = vmatpush3.msra.mxu0 %v74_v2  ;;  %v105_v7 = vld [vmem:[#allocation5 + $0x170] sm:$0xff]  ;;  %v72_v10 = vld [vmem:[#allocation5 + $0x68] sm:$0xff] }
  0x21   :  { %554 = vmatpush3.msra.mxu1 %v106_v3  ;;  %517 = vmatprep.subr.mxu0 %v89_v4  ;;  %v104_v11 = vld [vmem:[#allocation5 + $0x168] sm:$0xff]  ;;  %v87_v12 = vld [vmem:[#allocation5 + $0xe0] sm:$0xff]  ;;  %v86_v16 = vld [vmem:[#allocation5 + $0xd8] sm:$0xff] }
  0x22   :  { %555 = vmatprep.subr.mxu1 %v121_v5  ;;  %518 = vmatpush3.msra.mxu0 %v73_v6  ;;  %v119_v13 = vld [vmem:[#allocation5 + $0x1e0] sm:$0xff]  ;;  %v118_v17 = vld [vmem:[#allocation5 + $0x1d8] sm:$0xff]  ;;  %v85_v20 = vld [vmem:[#allocation5 + $0xd0] sm:$0xff] }
  0x23   :  { %556 = vmatpush3.msra.mxu1 %v105_v7  ;;  %519 = vmatprep.subr.mxu0 %v88_v8  ;;  %v71_v14 = vld [vmem:[#allocation5 + $0x60] sm:$0xff]  ;;  %v70_v18 = vld [vmem:[#allocation5 + $0x58] sm:$0xff]  ;;  %v117_v21 = vld [vmem:[#allocation5 + $0x1d0] sm:$0xff] }
  0x24   :  { %557 = vmatprep.subr.mxu1 %v120_v9  ;;  %v103_v15 = vld [vmem:[#allocation5 + $0x160] sm:$0xff]  ;;  %520 = vmatpush3.msra.mxu0 %v72_v10  ;;  %v102_v19 = vld [vmem:[#allocation5 + $0x158] sm:$0xff]  ;;  %v69_v22 = vld [vmem:[#allocation5 + $0x50] sm:$0xff] }
  0x25   :  { %558 = vmatpush3.msra.mxu1 %v104_v11  ;;  %521 = vmatprep.subr.mxu0 %v87_v12  ;;  %v101_v23 = vld [vmem:[#allocation5 + $0x150] sm:$0xff]  ;;  %v84_v24 = vld [vmem:[#allocation5 + $0xc8] sm:$0xff]  ;;  %v83_v28 = vld [vmem:[#allocation5 + $0xc0] sm:$0xff] }
  0x26   :  { %559 = vmatprep.subr.mxu1 %v119_v13  ;;  %522 = vmatpush3.msra.mxu0 %v71_v14  ;;  %v116_v25 = vld [vmem:[#allocation5 + $0x1c8] sm:$0xff]  ;;  %v115_v29 = vld [vmem:[#allocation5 + $0x1c0] sm:$0xff]  ;;  %v82_v32 = vld [vmem:[#allocation5 + $0xb8] sm:$0xff] }
  0x27   :  { %560 = vmatpush3.msra.mxu1 %v103_v15  ;;  %523 = vmatprep.subr.mxu0 %v86_v16  ;;  %v68_v26 = vld [vmem:[#allocation5 + $0x48] sm:$0xff]  ;;  %v67_v30 = vld [vmem:[#allocation5 + $0x40] sm:$0xff]  ;;  %v114_v33 = vld [vmem:[#allocation5 + $0x1b8] sm:$0xff] }
  0x28   :  { %561 = vmatprep.subr.mxu1 %v118_v17  ;;  %524 = vmatpush3.msra.mxu0 %v70_v18  ;;  %v100_v27 = vld [vmem:[#allocation5 + $0x148] sm:$0xff]  ;;  %v99_v31 = vld [vmem:[#allocation5 + $0x140] sm:$0xff]  ;;  %v66_v34 = vld [vmem:[#allocation5 + $0x38] sm:$0xff] }
  0x29   :  { %562 = vmatpush3.msra.mxu1 %v102_v19  ;;  %525 = vmatprep.subr.mxu0 %v85_v20  ;;  %v98_v35 = vld [vmem:[#allocation5 + $0x138] sm:$0xff]  ;;  %v81_v36 = vld [vmem:[#allocation5 + $0xb0] sm:$0xff]  ;;  %v80_v40 = vld [vmem:[#allocation5 + $0xa8] sm:$0xff] }
  0x2a   :  { %563 = vmatprep.subr.mxu1 %v117_v21  ;;  %526 = vmatpush3.msra.mxu0 %v69_v22  ;;  %v113_v37 = vld [vmem:[#allocation5 + $0x1b0] sm:$0xff]  ;;  %v112_v41 = vld [vmem:[#allocation5 + $0x1a8] sm:$0xff]  ;;  %v79_v44 = vld [vmem:[#allocation5 + $0xa0] sm:$0xff] }
  0x2b   :  { %564 = vmatpush3.msra.mxu1 %v101_v23  ;;  %527 = vmatprep.subr.mxu0 %v84_v24  ;;  %v65_v38 = vld [vmem:[#allocation5 + $0x30] sm:$0xff]  ;;  %v64_v42 = vld [vmem:[#allocation5 + $0x28] sm:$0xff]  ;;  %v111_v45 = vld [vmem:[#allocation5 + $0x1a0] sm:$0xff] }
  0x2c   :  { %565 = vmatprep.subr.mxu1 %v116_v25  ;;  %528 = vmatpush3.msra.mxu0 %v68_v26  ;;  %v97_v39 = vld [vmem:[#allocation5 + $0x130] sm:$0xff]  ;;  %v96_v43 = vld [vmem:[#allocation5 + $0x128] sm:$0xff]  ;;  %v63_v46 = vld [vmem:[#allocation5 + $0x20] sm:$0xff] }
  0x2d   :  { %566 = vmatpush3.msra.mxu1 %v100_v27  ;;  %529 = vmatprep.subr.mxu0 %v83_v28  ;;  %v95_v47 = vld [vmem:[#allocation5 + $0x120] sm:$0xff]  ;;  %v78_v48 = vld [vmem:[#allocation5 + $0x98] sm:$0xff]  ;;  %v77_v52 = vld [vmem:[#allocation5 + $0x90] sm:$0xff] }
  0x2e   :  { %567 = vmatprep.subr.mxu1 %v115_v29  ;;  %530 = vmatpush3.msra.mxu0 %v67_v30  ;;  %v110_v49 = vld [vmem:[#allocation5 + $0x198] sm:$0xff]  ;;  %v109_v53 = vld [vmem:[#allocation5 + $0x190] sm:$0xff]  ;;  %v76_v56 = vld [vmem:[#allocation5 + $0x88] sm:$0xff] }
  0x2f   :  { %568 = vmatpush3.msra.mxu1 %v99_v31  ;;  %531 = vmatprep.subr.mxu0 %v82_v32  ;;  %v62_v50 = vld [vmem:[#allocation5 + $0x18] sm:$0xff]  ;;  %v61_v54 = vld [vmem:[#allocation5 + $0x10] sm:$0xff]  ;;  %v108_v57 = vld [vmem:[#allocation5 + $0x188] sm:$0xff] }
  0x30   :  { %569 = vmatprep.subr.mxu1 %v114_v33  ;;  %532 = vmatpush3.msra.mxu0 %v66_v34  ;;  %v94_v51 = vld [vmem:[#allocation5 + $0x118] sm:$0xff]  ;;  %v93_v55 = vld [vmem:[#allocation5 + $0x110] sm:$0xff]  ;;  %v60_v58 = vld [vmem:[#allocation5 + $0x8] sm:$0xff] }
  0x31   :  { %570 = vmatpush3.msra.mxu1 %v98_v35  ;;  %533 = vmatprep.subr.mxu0 %v81_v36  ;;  %v92_v59 = vld [vmem:[#allocation5 + $0x108] sm:$0xff]  ;;  %v75_v60 = vld [vmem:[#allocation5 + $0x80] sm:$0xff]  ;;  %v46_v2 = vld [vmem:[#allocation2 + $0x18] sm:$0xff] }
  0x32   :  { %571 = vmatprep.subr.mxu1 %v113_v37  ;;  %534 = vmatpush3.msra.mxu0 %v65_v38  ;;  %v107_v61 = vld [vmem:[#allocation5 + $0x180] sm:$0xff]  ;;  %v44_v63 = vld [vmem:[#allocation2 + $0x8] sm:$0xff]  ;;  %v154_v3 = vld [vmem:[#allocation5 + $0x2f8] sm:$0xff] }
  0x33   :  { %572 = vmatpush3.msra.mxu1 %v97_v39  ;;  %535 = vmatprep.subr.mxu0 %v80_v40  ;;  %v59_v62 = vld [vmem:[#allocation5] sm:$0xff]  ;;  %v186_v4 = vld [vmem:[#allocation5 + $0x3f8] sm:$0xff]  ;;  %v45_v5 = vld [vmem:[#allocation2 + $0x10] sm:$0xff] }
  0x34   :  { %573 = vmatprep.subr.mxu1 %v112_v41  ;;  %536 = vmatpush3.msra.mxu0 %v64_v42  ;;  %v91_v0 = vld [vmem:[#allocation5 + $0x100] sm:$0xff]  ;;  %v138_v6 = vld [vmem:[#allocation5 + $0x278] sm:$0xff]  ;;  %v153_v8 = vld [vmem:[#allocation5 + $0x2f0] sm:$0xff] }
  0x35   :  { %574 = vmatpush3.msra.mxu1 %v96_v43  ;;  %537 = vmatprep.subr.mxu0 %v79_v44  ;;  %v43_v1 = vld [vmem:[#allocation2] sm:$0xff]  ;;  %v170_v7 = vld [vmem:[#allocation5 + $0x378] sm:$0xff]  ;;  %v185_v9 = vld [vmem:[#allocation5 + $0x3f0] sm:$0xff] }
  0x36   :  { %575 = vmatprep.subr.mxu1 %v111_v45  ;;  %538 = vmatpush3.msra.mxu0 %v63_v46  ;;  %v137_v10 = vld [vmem:[#allocation5 + $0x270] sm:$0xff]  ;;  %v152_v12 = vld [vmem:[#allocation5 + $0x2e8] sm:$0xff]  ;;  %v151_v16 = vld [vmem:[#allocation5 + $0x2e0] sm:$0xff] }
  0x37   :  { %576 = vmatpush3.msra.mxu1 %v95_v47  ;;  %539 = vmatprep.subr.mxu0 %v78_v48  ;;  %v169_v11 = vld [vmem:[#allocation5 + $0x370] sm:$0xff]  ;;  %v184_v13 = vld [vmem:[#allocation5 + $0x3e8] sm:$0xff]  ;;  %v183_v17 = vld [vmem:[#allocation5 + $0x3e0] sm:$0xff] }
  0x38   :  { %577 = vmatprep.subr.mxu1 %v110_v49  ;;  %540 = vmatpush3.msra.mxu0 %v62_v50  ;;  %v136_v14 = vld [vmem:[#allocation5 + $0x268] sm:$0xff]  ;;  %v135_v18 = vld [vmem:[#allocation5 + $0x260] sm:$0xff]  ;;  %v150_v20 = vld [vmem:[#allocation5 + $0x2d8] sm:$0xff] }
  0x39   :  { %578 = vmatpush3.msra.mxu1 %v94_v51  ;;  %541 = vmatprep.subr.mxu0 %v77_v52  ;;  %v168_v15 = vld [vmem:[#allocation5 + $0x368] sm:$0xff]  ;;  %v167_v19 = vld [vmem:[#allocation5 + $0x360] sm:$0xff]  ;;  %v182_v21 = vld [vmem:[#allocation5 + $0x3d8] sm:$0xff] }
  0x3a   :  { %579 = vmatprep.subr.mxu1 %v109_v53  ;;  %542 = vmatpush3.msra.mxu0 %v61_v54  ;;  %v134_v22 = vld [vmem:[#allocation5 + $0x258] sm:$0xff]  ;;  %v149_v24 = vld [vmem:[#allocation5 + $0x2d0] sm:$0xff]  ;;  %v148_v28 = vld [vmem:[#allocation5 + $0x2c8] sm:$0xff] }
  0x3b   :  { %580 = vmatpush3.msra.mxu1 %v93_v55  ;;  %543 = vmatprep.subr.mxu0 %v76_v56  ;;  %v166_v23 = vld [vmem:[#allocation5 + $0x358] sm:$0xff]  ;;  %v181_v25 = vld [vmem:[#allocation5 + $0x3d0] sm:$0xff]  ;;  %v180_v29 = vld [vmem:[#allocation5 + $0x3c8] sm:$0xff] }
  0x3c   :  { %581 = vmatprep.subr.mxu1 %v108_v57  ;;  %544 = vmatpush3.msra.mxu0 %v60_v58  ;;  %v133_v26 = vld [vmem:[#allocation5 + $0x250] sm:$0xff]  ;;  %v132_v30 = vld [vmem:[#allocation5 + $0x248] sm:$0xff]  ;;  %v147_v32 = vld [vmem:[#allocation5 + $0x2c0] sm:$0xff] }
  0x3d   :  { %582 = vmatpush3.msra.mxu1 %v92_v59  ;;  %545 = vmatprep.subr.mxu0 %v75_v60  ;;  %v165_v27 = vld [vmem:[#allocation5 + $0x350] sm:$0xff]  ;;  %v164_v31 = vld [vmem:[#allocation5 + $0x348] sm:$0xff]  ;;  %v179_v33 = vld [vmem:[#allocation5 + $0x3c0] sm:$0xff] }
  0x3e   :  { %583 = vmatprep.subr.mxu1 %v107_v61  ;;  %546 = vmatpush3.msra.mxu0 %v59_v62  ;;  %v131_v34 = vld [vmem:[#allocation5 + $0x240] sm:$0xff]  ;;  %v146_v36 = vld [vmem:[#allocation5 + $0x2b8] sm:$0xff]  ;;  %v145_v40 = vld [vmem:[#allocation5 + $0x2b0] sm:$0xff] }
  0x3f   :  { %258 = vmatprep.mubr.f32.mxu0 %v44_v63  ;;  %584 = vmatpush3.msra.mxu1 %v91_v0  ;;  %v163_v35 = vld [vmem:[#allocation5 + $0x340] sm:$0xff]  ;;  %v178_v37 = vld [vmem:[#allocation5 + $0x3b8] sm:$0xff]  ;;  %v177_v41 = vld [vmem:[#allocation5 + $0x3b0] sm:$0xff] }
  0x40   :  { %259 = vmatmul.mubr.f32.vlgmr.msra.gmra.mxu0 %v43_v1  ;;  %333 = vmatprep.mubr.f32.mxu1 %v46_v2  ;;  %v130_v38 = vld [vmem:[#allocation5 + $0x238] sm:$0xff]  ;;  %v129_v42 = vld [vmem:[#allocation5 + $0x230] sm:$0xff]  ;;  %v144_v44 = vld [vmem:[#allocation5 + $0x2a8] sm:$0xff] }
  0x41   :  { %591 = vmatprep.subr.mxu0 %v154_v3  ;;  %629 = vmatprep.subr.mxu1 %v186_v4  ;;  %v162_v39 = vld [vmem:[#allocation5 + $0x338] sm:$0xff]  ;;  %v161_v43 = vld [vmem:[#allocation5 + $0x330] sm:$0xff]  ;;  %v176_v45 = vld [vmem:[#allocation5 + $0x3a8] sm:$0xff] }
  0x42   :  { %334 = vmatmul.mubr.f32.vlgmr.msra.gmra.mxu1 %v45_v5  ;;  %592 = vmatpush3.msra.mxu0 %v138_v6  ;;  %v128_v46 = vld [vmem:[#allocation5 + $0x228] sm:$0xff]  ;;  %v143_v48 = vld [vmem:[#allocation5 + $0x2a0] sm:$0xff]  ;;  %v142_v52 = vld [vmem:[#allocation5 + $0x298] sm:$0xff] }
  0x43   :  { %630 = vmatpush3.msra.mxu1 %v170_v7  ;;  %593 = vmatprep.subr.mxu0 %v153_v8  ;;  %v160_v47 = vld [vmem:[#allocation5 + $0x328] sm:$0xff]  ;;  %v175_v49 = vld [vmem:[#allocation5 + $0x3a0] sm:$0xff]  ;;  %v174_v53 = vld [vmem:[#allocation5 + $0x398] sm:$0xff] }
  0x44   :  { %631 = vmatprep.subr.mxu1 %v185_v9  ;;  %594 = vmatpush3.msra.mxu0 %v137_v10  ;;  %v127_v50 = vld [vmem:[#allocation5 + $0x220] sm:$0xff]  ;;  %v52_v54 = vld [vmem:[#allocation2 + $0x48] sm:$0xff]  ;;  %v126_v55 = vld [vmem:[#allocation5 + $0x218] sm:$0xff] }
  0x45   :  { %632 = vmatpush3.msra.mxu1 %v169_v11  ;;  %595 = vmatprep.subr.mxu0 %v152_v12  ;;  %v159_v51 = vld [vmem:[#allocation5 + $0x320] sm:$0xff]  ;;  %v158_v56 = vld [vmem:[#allocation5 + $0x318] sm:$0xff]  ;;  %v141_v58 = vld [vmem:[#allocation5 + $0x290] sm:$0xff] }
  0x46   :  { %633 = vmatprep.subr.mxu1 %v184_v13  ;;  %596 = vmatpush3.msra.mxu0 %v136_v14  ;;  %v51_v57 = vld [vmem:[#allocation2 + $0x40] sm:$0xff]  ;;  %v173_v59 = vld [vmem:[#allocation5 + $0x390] sm:$0xff]  ;;  %v54_v60 = vld [vmem:[#allocation2 + $0x58] sm:$0xff] }
  0x47   :  { %634 = vmatpush3.msra.mxu1 %v168_v15  ;;  %597 = vmatprep.subr.mxu0 %v151_v16  ;;  %v125_v61 = vld [vmem:[#allocation5 + $0x210] sm:$0xff]  ;;  %v140_v63 = vld [vmem:[#allocation5 + $0x288] sm:$0xff]  ;;  %v139_v4 = vld [vmem:[#allocation5 + $0x280] sm:$0xff] }
  0x48   :  { %635 = vmatprep.subr.mxu1 %v183_v17  ;;  %598 = vmatpush3.msra.mxu0 %v135_v18  ;;  %v157_v62 = vld [vmem:[#allocation5 + $0x310] sm:$0xff]  ;;  %v172_v1 = vld [vmem:[#allocation5 + $0x388] sm:$0xff]  ;;  %v171_v5 = vld [vmem:[#allocation5 + $0x380] sm:$0xff] }
  0x49   :  { %636 = vmatpush3.msra.mxu1 %v167_v19  ;;  %599 = vmatprep.subr.mxu0 %v150_v20  ;;  %v53_v0 = vld [vmem:[#allocation2 + $0x50] sm:$0xff]  ;;  %v124_v2 = vld [vmem:[#allocation5 + $0x208] sm:$0xff]  ;;  %v123_v6 = vld [vmem:[#allocation5 + $0x200] sm:$0xff] }
  0x4a   :  { %637 = vmatprep.subr.mxu1 %v182_v21  ;;  %600 = vmatpush3.msra.mxu0 %v134_v22  ;;  %v156_v3 = vld [vmem:[#allocation5 + $0x308] sm:$0xff]  ;;  %v155_v8 = vld [vmem:[#allocation5 + $0x300] sm:$0xff]  ;;  %v50_v9 = vld [vmem:[#allocation2 + $0x38] sm:$0xff] }
  0x4b   :  { %638 = vmatpush3.msra.mxu1 %v166_v23  ;;  %601 = vmatprep.subr.mxu0 %v149_v24  ;;  %v48_v7 = vld [vmem:[#allocation2 + $0x28] sm:$0xff]  ;;  %v47_v10 = vld [vmem:[#allocation2 + $0x20] sm:$0xff]  ;;  %v49_v11 = vld [vmem:[#allocation2 + $0x30] sm:$0xff] }
  0x4c   :  { %639 = vmatprep.subr.mxu1 %v181_v25  ;;  %602 = vmatpush3.msra.mxu0 %v133_v26  ;;  %v56_v12 = vld [vmem:[#allocation2 + $0x68] sm:$0xff]  ;;  %v58_v13 = vld [vmem:[#allocation2 + $0x78] sm:$0xff]  ;;  %v55_v14 = vld [vmem:[#allocation2 + $0x60] sm:$0xff] }
  0x4d   :  { %640 = vmatpush3.msra.mxu1 %v165_v27  ;;  %603 = vmatprep.subr.mxu0 %v148_v28  ;;  %v57_v15 = vld [vmem:[#allocation2 + $0x70] sm:$0xff]  ;;  %v514_v23 = vld [vmem:[%s787_s2] ss:$0 sm:$0xff]  ;;  %s746_s2 = smov [#allocation7]  }
  0x4e   :  { %641 = vmatprep.subr.mxu1 %v180_v29  ;;  %604 = vmatpush3.msra.mxu0 %v132_v30  ;;  %s501_s26 = sshll.u32 %s746_s2, 4  ;;  %s502_s26 = int_to_ptr.vmem [resolvable:$true] %s501_s26 }
  0x4f   :  { %642 = vmatpush3.msra.mxu1 %v164_v31  ;;  %605 = vmatprep.subr.mxu0 %v147_v32  ;;  %s714_s27 = scalar_lea.vmem %s502_s26, 256  ;;  %p719_p11 = scmp.lt.s32.totalorder %s502_s26, %s502_s26 }
  0x50   :  { %643 = vmatprep.subr.mxu1 %v179_v33  ;;  %606 = vmatpush3.msra.mxu0 %v131_v34  ;;  %p715_p10 = scmp.ne.s32.totalorder %s502_s26, %s714_s27  ;;  %p720_p12 = scmp.lt.s32.totalorder %s714_s27, %s714_s27 }
  0x51   :  { %644 = vmatpush3.msra.mxu1 %v163_v35  ;;  %607 = vmatprep.subr.mxu0 %v146_v36 }
  0x52   :  { %645 = vmatprep.subr.mxu1 %v178_v37  ;;  %608 = vmatpush3.msra.mxu0 %v130_v38  ;;  %p721_p13 = por %p720_p12, %p719_p11 }
  0x53   :  { %646 = vmatpush3.msra.mxu1 %v162_v39  ;;  %609 = vmatprep.subr.mxu0 %v145_v40 }
  0x54   :  { %647 = vmatprep.subr.mxu1 %v177_v41  ;;  %610 = vmatpush3.msra.mxu0 %v129_v42  ;;  %p722_p0 = pnand %p721_p13, %p715_p10 }
  0x55   :  { %648 = vmatpush3.msra.mxu1 %v161_v43  ;;  %611 = vmatprep.subr.mxu0 %v144_v44 }
  0x56   :  { %649 = vmatprep.subr.mxu1 %v176_v45  ;;  %612 = vmatpush3.msra.mxu0 %v128_v46 }
  0x57   :  { %650 = vmatpush3.msra.mxu1 %v160_v47  ;;  %613 = vmatprep.subr.mxu0 %v143_v48 }
  0x58   :  { %651 = vmatprep.subr.mxu1 %v175_v49  ;;  %614 = vmatpush3.msra.mxu0 %v127_v50 }
  0x59   :  { %652 = vmatpush3.msra.mxu1 %v159_v51  ;;  %615 = vmatprep.subr.mxu0 %v142_v52 }
  0x5a   :  { %653 = vmatprep.subr.mxu1 %v174_v53  ;;  %263 = vmatprep.mubr.f32.mxu0 %v52_v54 }
  0x5b   :  { %616 = vmatpush3.msra.mxu0 %v126_v55  ;;  %654 = vmatpush3.msra.mxu1 %v158_v56 }
  0x5c   :  { %264 = vmatmul.mubr.f32.gmra.mxu0 %v51_v57  ;;  %617 = vmatprep.subr.mxu0 %v141_v58 }
  0x5d   :  { %655 = vmatprep.subr.mxu1 %v173_v59  ;;  %338 = vmatprep.mubr.f32.mxu1 %v54_v60 }
  0x5e   :  { %618 = vmatpush3.msra.mxu0 %v125_v61  ;;  %656 = vmatpush3.msra.mxu1 %v157_v62 }
  0x5f   :  { %619 = vmatprep.subr.mxu0 %v140_v63  ;;  %339 = vmatmul.mubr.f32.gmra.mxu1 %v53_v0 }
  0x60   :  { %657 = vmatprep.subr.mxu1 %v172_v1  ;;  %620 = vmatpush3.msra.mxu0 %v124_v2 }
  0x61   :  { %658 = vmatpush3.msra.mxu1 %v156_v3  ;;  %621 = vmatprep.subr.mxu0 %v139_v4 }
  0x62   :  { %659 = vmatprep.subr.mxu1 %v171_v5  ;;  %622 = vmatpush3.msra.mxu0 %v123_v6 }
  0x63   :  { %408 = vmatprep.mubr.f32.mxu0 %v48_v7  ;;  %660 = vmatpush3.msra.mxu1 %v155_v8 }
  0x64   :  { %483 = vmatprep.mubr.f32.mxu1 %v50_v9  ;;  %409 = vmatmul.mubr.f32.vlgmr.msra.gmra.mxu0 %v47_v10 }
  0x65   :  { %484 = vmatmul.mubr.f32.vlgmr.msra.gmra.mxu1 %v49_v11  ;;  %413 = vmatprep.mubr.f32.mxu0 %v56_v12 }
  0x66   :  { %488 = vmatprep.mubr.f32.mxu1 %v58_v13 }
  0x68   :  { %414 = vmatmul.mubr.f32.gmra.mxu0 %v55_v14 }
  0x69   :  { %489 = vmatmul.mubr.f32.gmra.mxu1 %v57_v15 }
 0x100   :  { %v547_v16 = vpop.f32.mrf.mxu0 }
 0x102   :  { %v585_v17 = vpop.f32.mrf.mxu1  ;;  %v548_v18 = vpop.f32.mrf.mxu0 }
 0x103   :  { %v549_v21 = vadd.f32 %v548_v18, %v547_v16 }
 0x104   :  { %v586_v20 = vpop.f32.mrf.mxu1 }
 0x105   :  { %v261_v26 = vadd.f32 %v549_v21, %v514_v23  ;;  %v587_v27 = vadd.f32 %v586_v20, %v585_v17 }
 0x107   :  { %v336_v33 = vadd.f32 %v587_v27, %v261_v26 }
 0x11c   :  { %v550_v19 = vpop.f32.mrf.mxu0 }
 0x11e   :  { %v551_v24 = vpop.f32.mrf.mxu0 }
 0x11f   :  { %v588_v22 = vpop.f32.mrf.mxu1  ;;  %v552_v28 = vadd.f32 %v551_v24, %v550_v19 }
 0x121   :  { %v589_v25 = vpop.f32.mrf.mxu1  ;;  %v266_v34 = vadd.f32 %v552_v28, %v514_v23 }
 0x122   :  { %v590_v35 = vadd.f32 %v589_v25, %v588_v22 }
 0x124   :  { %v623_v29 = vpop.f32.mrf.mxu0  ;;  %v341_v43 = vadd.f32 %v590_v35, %v266_v34 }
 0x125   :  { %v661_v30 = vpop.f32.mrf.mxu1 }
 0x126   :  { %v624_v31 = vpop.f32.mrf.mxu0 }
 0x127   :  { %v662_v32 = vpop.f32.mrf.mxu1  ;;  %v625_v36 = vadd.f32 %v624_v31, %v623_v29 }
 0x128   :  { %v626_v37 = vpop.f32.mrf.mxu0  ;;  %v663_v40 = vadd.f32 %v662_v32, %v661_v30 }
 0x129   :  { %v664_v38 = vpop.f32.mrf.mxu1  ;;  %v411_v39 = vadd.f32 %v625_v36, %v336_v33 }
 0x12a   :  { %v627_v41 = vpop.f32.mrf.mxu0 }
 0x12b   :  { %v665_v42 = vpop.f32.mrf.mxu1  ;;  %v486_v44 = vadd.f32 %v663_v40, %v411_v39  ;;  %v628_v45 = vadd.f32 %v627_v41, %v626_v37 }
 0x12c   :  { %v666_v47 = vadd.f32 %v665_v42, %v664_v38 }
 0x12d   :  { %494 = vst [vmem:[#allocation7] sm:$0xff] %v486_v44  ;;  %v416_v46 = vadd.f32 %v628_v45, %v341_v43 }
 0x12f   :  { %v491_v48 = vadd.f32 %v666_v47, %v416_v46 }
 0x131   :  { %495 = vst [vmem:[#allocation7 + $0x8] sm:$0xff] %v491_v48 }
 0x132   :  { %725 = shalt.err (!%p722_p0)
}
 0x133   :  { %507 = dma.vmem_to_hbm [thread:$0]  %s502_s26, 256, %s788_s3, [#allocation4], %s744_s22, %s744_s22, %s745_s23  }
 0x134   :  { %738 = dma.done.wait [#allocation4], 256  }
 0x135   :  { %739 = vsyncadd [#allocation4], 4294967040 }
 0x136   :  { %511 = vsyncpa [#allocation3], 1 }
 0x137   :  { %512 = vsyncpa [#allocation6], 1 }
 0x138   :  { %513 = vsyncpa [#allocation4], 1 }

</bundles_post_ra>
